<compile_context>
chip_gen: v6e
topology: v6e:2x2x1
jax: 0.10.0
libtpu: 0.0.40
codegen_flags: <defaults>
</compile_context>

<pallas_src>
import functools

import jax
import jax.numpy as jnp
from jax import lax
from jax.experimental import pallas as pl
from jax.experimental.pallas import tpu as pltpu

LANE = 128
SUBLANE = 8


def logreg_kernel(x_ref, w_ref, b_ref, o_ref):
    # x_ref: (TB, Din) bf16, w_ref: (Dout_pad, Din) bf16,
    # b_ref: (1, Dout_pad) f32, o_ref: (TB, Dout_pad) f32
    logits = lax.dot_general(
        x_ref[...], w_ref[...],
        dimension_numbers=(((1,), (1,)), ((), ())),   # contract Din of both
        preferred_element_type=jnp.float32,
    )
    logits = logits + b_ref[...]                      # broadcast (1, Dout_pad)
    # numerically-stable softmax over the class dim (f32 epilogue)
    m = jnp.max(logits, axis=-1, keepdims=True)
    e = jnp.exp(logits - m)                           # padded cols -> exp(-1e30 - m) = 0
    denom = jnp.sum(e, axis=-1, keepdims=True)
    o_ref[...] = (e * pl.reciprocal(denom, approx=True)).astype(o_ref.dtype)


@functools.partial(jax.jit, static_argnames=("block_b",))
def logistic_regression(x, weight, bias, *, block_b=512):
    """x: (B, Din) f32; weight: (Dout, Din) f32 (torch Linear layout); bias: (Dout,) f32."""
    B, Din = x.shape
    Dout = weight.shape[0]
    Dout_pad = pl.cdiv(Dout, LANE) * LANE

    # --- parameter prep (ideally done once at parameter-creation time) ---
    w_pad = jnp.pad(weight.astype(jnp.bfloat16), ((0, Dout_pad - Dout), (0, 0)))
    b_pad = jnp.pad(
        bias.astype(jnp.float32).reshape(1, Dout),
        ((0, 0), (0, Dout_pad - Dout)),
        constant_values=jnp.float32(-1e30),
    )

    # --- batch tiling: largest tile <= block_b, sublane-aligned ---
    TB = min(block_b, max(SUBLANE, pl.cdiv(B, SUBLANE) * SUBLANE))
    B_pad = pl.cdiv(B, TB) * TB
    x_bf16 = x.astype(jnp.bfloat16)
    if B_pad != B:
        x_bf16 = jnp.pad(x_bf16, ((0, B_pad - B), (0, 0)))

    out = pl.pallas_call(
        logreg_kernel,
        out_shape=jax.ShapeDtypeStruct((B_pad, Dout_pad), jnp.float32),
        grid_spec=pltpu.PrefetchScalarGridSpec(
            num_scalar_prefetch=0,
            grid=(B_pad // TB,),
            in_specs=[
                pl.BlockSpec((TB, Din), lambda i: (i, 0)),        # x: tiled on batch
                pl.BlockSpec((Dout_pad, Din), lambda i: (0, 0)),  # W: VMEM-resident
                pl.BlockSpec((1, Dout_pad), lambda i: (0, 0)),    # b: VMEM-resident
            ],
            out_specs=pl.BlockSpec((TB, Dout_pad), lambda i: (i, 0)),
        ),
        compiler_params=pltpu.CompilerParams(
            dimension_semantics=("parallel",),        # megacore on v7x
            vmem_limit_bytes=64 * 1024 * 1024,
        ),
    )(x_bf16, w_pad, b_pad)

    # strip batch / class padding (plain-JAX glue, fused under jit)
    return out[:B, :Dout]
    # TODO(synk): for vocab-scale Dout / very large Din, add a K-reduction grid
    # axis with an f32 accumulator and an online (flash-style) softmax.


if __name__ == "__main__":
    key = jax.random.PRNGKey(0)
    k_x, k_w, k_b = jax.random.split(key, 3)

    batch = 8
    input_dim = 32
    output_dim = 16

    # torch.nn.Linear-style deterministic init: U(-1/sqrt(in), 1/sqrt(in))
    bound = 1.0 / (input_dim ** 0.5)
    weight = jax.random.uniform(k_w, (output_dim, input_dim),
                                minval=-bound, maxval=bound, dtype=jnp.float32)
    bias = jax.random.uniform(k_b, (output_dim,),
                              minval=-bound, maxval=bound, dtype=jnp.float32)

    x = jax.random.normal(k_x, (batch, input_dim), dtype=jnp.float32)

    out = logistic_regression(x, weight, bias)
    out = jax.block_until_ready(out)

    # reference mirroring the kernel's bf16-in / f32-accumulate matmul
    ref_logits = jnp.dot(x.astype(jnp.bfloat16),
                         weight.astype(jnp.bfloat16).T,
                         preferred_element_type=jnp.float32) + bias
    ref = jax.nn.softmax(ref_logits, axis=-1)

    assert out.shape == (batch, output_dim)
    # approx reciprocal introduces ~1e-3 relative error in the normalization
    assert jnp.allclose(out, ref, atol=3e-3, rtol=3e-3)
    # loose sanity vs. full-f32 reference
    ref_f32 = jax.nn.softmax(x @ weight.T + bias, axis=-1)
    assert jnp.allclose(out, ref_f32, atol=2e-2, rtol=2e-2)
    # each row of probabilities must sum to ~1
    assert jnp.allclose(jnp.sum(out, axis=-1), 1.0, atol=3e-3)

    print("KERNEL_OK")
</pallas_src>

<mosaic_0001>
module attributes {stable_mosaic.version = 11 : i64} {
  func.func @logreg_kernel(%arg0: i32, %arg1: memref<8x32xbf16, #tpu.memory_space<vmem>>, %arg2: memref<128x32xbf16, #tpu.memory_space<vmem>>, %arg3: memref<1x128xf32, #tpu.memory_space<vmem>>, %arg4: memref<8x128xf32, #tpu.memory_space<vmem>>) attributes {dimension_semantics = [#tpu.dimension_semantics<parallel>], iteration_bounds = array<i64: 1>, scalar_prefetch = 0 : i64, scratch_operands = 0 : i64, tpu.core_type = #tpu.core_type<tc>, window_params = [{transform_indices = @transform_0, window_bounds = array<i64: 8, 32>}, {pipeline_mode = #tpu.pipeline_mode<synchronous>, transform_indices = @transform_1, window_bounds = array<i64: 128, 32>}, {pipeline_mode = #tpu.pipeline_mode<synchronous>, transform_indices = @transform_2, window_bounds = array<i64: 1, 128>}, {transform_indices = @transform_3, window_bounds = array<i64: 8, 128>}]} {
    %c0 = arith.constant 0 : index
    %c0_0 = arith.constant 0 : index
    %0 = vector.load %arg1[%c0, %c0_0] : memref<8x32xbf16, #tpu.memory_space<vmem>>, vector<8x32xbf16>
    %c0_1 = arith.constant 0 : index
    %c0_2 = arith.constant 0 : index
    %1 = vector.load %arg2[%c0_1, %c0_2] : memref<128x32xbf16, #tpu.memory_space<vmem>>, vector<128x32xbf16>
    %cst = arith.constant dense<0.000000e+00> : vector<8x128xf32>
    %2 = tpu.matmul %0, %1, %cst {dimension_numbers = #tpu.dot_dimension_numbers<[1], [1], [0], [0], [0, 0, 1, 0], [], []>} : vector<8x32xbf16>, vector<128x32xbf16>, vector<8x128xf32> -> vector<8x128xf32>
    %c0_3 = arith.constant 0 : index
    %c0_4 = arith.constant 0 : index
    %3 = vector.load %arg3[%c0_3, %c0_4] : memref<1x128xf32, #tpu.memory_space<vmem>>, vector<1x128xf32>
    %4 = vector.broadcast %3 : vector<1x128xf32> to vector<8x128xf32>
    %5 = arith.addf %2, %4 : vector<8x128xf32>
    %cst_5 = arith.constant dense<0xFF800000> : vector<8xf32>
    %6 = vector.multi_reduction <maximumf>, %5, %cst_5 [1] : vector<8x128xf32> to vector<8xf32>
    %7 = vector.shape_cast %6 : vector<8xf32> to vector<8x1xf32>
    %8 = vector.broadcast %7 : vector<8x1xf32> to vector<8x128xf32>
    %9 = arith.subf %5, %8 : vector<8x128xf32>
    %10 = math.exp %9 : vector<8x128xf32>
    %cst_6 = arith.constant dense<0.000000e+00> : vector<8xf32>
    %11 = vector.multi_reduction <add>, %10, %cst_6 [1] : vector<8x128xf32> to vector<8xf32>
    %12 = vector.shape_cast %11 : vector<8xf32> to vector<8x1xf32>
    %13 = tpu.reciprocal %12 {approx = true} : vector<8x1xf32> -> vector<8x1xf32>
    %14 = vector.broadcast %13 : vector<8x1xf32> to vector<8x128xf32>
    %15 = arith.mulf %10, %14 : vector<8x128xf32>
    %c0_7 = arith.constant 0 : index
    %c0_8 = arith.constant 0 : index
    %16 = vector.load %arg4[%c0_7, %c0_8] : memref<8x128xf32, #tpu.memory_space<vmem>>, vector<8x128xf32>
    tpu.vector_store %arg4[%c0_7, %c0_8], %15 {strides = array<i32>} : memref<8x128xf32, #tpu.memory_space<vmem>>, vector<8x128xf32>,
    return
  }
  func.func @transform_0(%arg0: i32) -> (i32, i32) {
    %c0_i32 = arith.constant 0 : i32
    %c0_i32_0 = arith.constant 0 : i32
    return %arg0, %c0_i32 : i32, i32
  }
  func.func @transform_1(%arg0: i32) -> (i32, i32) {
    %c0_i32 = arith.constant 0 : i32
    %c0_i32_0 = arith.constant 0 : i32
    %c0_i32_1 = arith.constant 0 : i32
    return %c0_i32, %c0_i32_0 : i32, i32
  }
  func.func @transform_2(%arg0: i32) -> (i32, i32) {
    %c0_i32 = arith.constant 0 : i32
    %c0_i32_0 = arith.constant 0 : i32
    %c0_i32_1 = arith.constant 0 : i32
    return %c0_i32, %c0_i32_0 : i32, i32
  }
  func.func @transform_3(%arg0: i32) -> (i32, i32) {
    %c0_i32 = arith.constant 0 : i32
    %c0_i32_0 = arith.constant 0 : i32
    return %arg0, %c0_i32 : i32, i32
  }
}

</mosaic_0001>

<bundles_post_ra>
// kernel: logistic_regression.1
= control target key start
LH: loop header
LB: loop body
LE: loop exit
PB: predicated region body
PF: predicated region fallthrough
CT: control target
= control target key end

     0   :  { %v248_v1 = vmov 0.0   ;;  %vm80_vm0 = vcmask 261120   ;;  %vm249_vm1 = vmmov 0   ;;  %s313_s0 = inlined_call_operand.vmem [shape: bf16[8,32], index: 0, kind: input, shape index: {}]   ;;  %s314_s1 = inlined_call_operand.vmem [shape: bf16[128,32], index: 1, kind: input, shape index: {}]   ;;  %s315_s2 = inlined_call_operand.vmem [shape: f32[1,128], index: 2, kind: input, shape index: {}]   ;;  %s316_s3 = inlined_call_operand.hbm [shape: f32[8,128], index: 3, kind: output, shape index: {}]  }
   0x1   :  { %v214_v0 = vld [vmem:[%s314_s1 + $0x38] sm:$0xff]   ;;  %191 = vmatprep.subr.bf16.mxu0 %v248_v1  ;;  %v215_v3 = vld [vmem:[%s314_s1 + $0x30] sm:$0xff]   ;;  %207 = vmatprep.mubr.msk.bf16.mxu0 %vm249_vm1, %v248_v1 }
   0x2   :  { %v106_v2 = vsel %vm80_vm0, %v214_v0, 0  ;;  %v103_v4 = vsel %vm80_vm0, %v215_v3, 0 }
   0x3   :  { %192 = vmatpush3.bf16.xpose.msra.mxu0 %v106_v2 }
   0x4   :  { %193 = vmatprep.subr.bf16.mxu0 %v248_v1 }
   0x5   :  { %8 = vsyncpa [#allocation3], 0  ;;  %v216_v5 = vld [vmem:[%s314_s1 + $0x28] sm:$0xff]   ;;  %v217_v7 = vld [vmem:[%s314_s1 + $0x20] sm:$0xff]  }
   0x6   :  { %v100_v6 = vsel %vm80_vm0, %v216_v5, 0  ;;  %v97_v8 = vsel %vm80_vm0, %v217_v7, 0  ;;  %v218_v9 = vld [vmem:[%s314_s1 + $0x18] sm:$0xff]   ;;  %v219_v11 = vld [vmem:[%s314_s1 + $0x10] sm:$0xff]   ;;  %v220_v13 = vld [vmem:[%s314_s1 + $0x8] sm:$0xff]  }
   0x7   :  { %v94_v10 = vsel %vm80_vm0, %v218_v9, 0  ;;  %v91_v12 = vsel %vm80_vm0, %v219_v11, 0  ;;  %v88_v14 = vsel %vm80_vm0, %v220_v13, 0  ;;  %v221_v15 = vld [vmem:[%s314_s1] sm:$0xff]  }
   0x8   :  { %v85_v16 = vsel %vm80_vm0, %v221_v15, 0  ;;  %v16_v17 = vld [vmem:[%s313_s0] sm:$0xf]  ;;  %s250_s0 = smov [#allocation2]  }
   0x9   :  { %v172_v18 = vld [vmem:[%s315_s2] ss:$0 sm:$0xff]  ;;  %s164_s1 = sshll.u32 %s250_s0, 4  ;;  %s165_s1 = int_to_ptr.vmem [resolvable:$true] %s164_s1 }
   0xa   :  { %s226_s2 = scalar_lea.vmem %s165_s1, 128  ;;  %p231_p1 = scmp.lt.s32.totalorder %s165_s1, %s165_s1 }
   0xb   :  { %194 = vmatpush3.bf16.xpose.msra.mxu0 %v103_v4  ;;  %p227_p0 = scmp.ne.s32.totalorder %s165_s1, %s226_s2  ;;  %p232_p2 = scmp.lt.s32.totalorder %s226_s2, %s226_s2 }
   0xc   :  { %195 = vmatprep.subr.bf16.mxu0 %v248_v1 }
   0xd   :  { %p233_p3 = por %p232_p2, %p231_p1 }
   0xf   :  { %p234_p4 = pnand %p233_p3, %p227_p0 }
  0x13   :  { %196 = vmatpush3.bf16.xpose.msra.mxu0 %v100_v6 }
  0x14   :  { %197 = vmatprep.subr.bf16.mxu0 %v248_v1 }
  0x1b   :  { %198 = vmatpush3.bf16.xpose.msra.mxu0 %v97_v8 }
  0x1c   :  { %199 = vmatprep.subr.bf16.mxu0 %v248_v1 }
  0x23   :  { %200 = vmatpush3.bf16.xpose.msra.mxu0 %v94_v10 }
  0x24   :  { %201 = vmatprep.subr.bf16.mxu0 %v248_v1 }
  0x2b   :  { %202 = vmatpush3.bf16.xpose.msra.mxu0 %v91_v12 }
  0x2c   :  { %203 = vmatprep.subr.bf16.mxu0 %v248_v1 }
  0x33   :  { %204 = vmatpush3.bf16.xpose.msra.mxu0 %v88_v14 }
  0x34   :  { %205 = vmatprep.subr.bf16.mxu0 %v248_v1 }
  0x3b   :  { %206 = vmatpush3.bf16.xpose.msra.mxu0 %v85_v16 }
  0x42   :  { %208 = vmatmul.mubr.msk.bf16.vlgmr.msra.gmra.mxu0 %vm80_vm0, %v16_v17 }
 0x102   :  { %v142_v19 = vpop.f32.mrf.mxu0 }
 0x103   :  { %v143_v20 = vadd.f32 %v172_v18, %v142_v19 }
 0x104   :  { %v209_v21 = vpop.f32.mrf.mxu0 }
 0x105   :  { %148 = vmax.xlane.f32.xlu0 %v143_v20 }
 0x106   :  { %v145_v22 = vpop.f32.mrf.mxu0 }
 0x108   :  { %v210_v23 = vpop.f32.mrf.mxu0 }
 0x18e   :  { %v149_v24 = vpop.xlane.xlu0 %148 }
 0x18f   :  { %v150_v25 = vsub.f32 %v143_v20, %v149_v24 }
 0x191   :  { %v151_v26 = vmul.f32 1.442695, %v150_v25 }
 0x193   :  { %222 = vpow2.f32 %v151_v26 }
 0x1a0   :  { %v223_v27 = vpop.eup %222 }
 0x1a1   :  { %153 = vadd.xlane.f32.xlu0 %v223_v27 }
 0x22a   :  { %v154_v28 = vpop.xlane.xlu0 %153 }
 0x22b   :  { %224 = vrcp.f32 %v154_v28 }
 0x238   :  { %v225_v29 = vpop.eup %224 }
 0x239   :  { %v156_v30 = vmul.f32 %v225_v29, %v223_v27 }
 0x23b   :  { %157 = vst [vmem:[#allocation2] sm:$0xff] %v156_v30 }
 0x23c   :  { %237 = shalt.err (!%p234_p4)
}
 0x23d   :  { %167 = dma.vmem_to_hbm [thread:$0]  %s165_s1, 128, %s316_s3, [#allocation3]  }
 0x23e   :  { %246 = dma.done.wait [#allocation3], 128  }
 0x23f   :  { %247 = vsyncadd [#allocation3], 4294967168 }
 0x240   :  { %171 = vsyncpa [#allocation3], 1 }

</bundles_post_ra>
